<compile_context>
chip_gen: v7x
topology: tpu7x:2x2x1
jax: 0.10.0
libtpu: 0.0.40
codegen_flags: <defaults>
</compile_context>

<pallas_src>
import functools

import jax
import jax.numpy as jnp
from jax.experimental import pallas as pl
from jax.experimental.pallas import tpu as pltpu


# --------------------------------------------------------------------------------------
# Shared helpers
# --------------------------------------------------------------------------------------

def _channel_conv_sigmoid(y, w_ref, *, k, pad, C):
    """sigmoid( zero-padded k-tap cross-correlation of y over the channel (lane) axis ).

    y: (rows, C) float32 with channels on lanes.  w_ref: (k,) float32 taps in SMEM.
    The zero pad is materialised on the value (no VMEM scratch round-trip); each tap is
    a statically-offset lane slice -> k shifted multiply-adds.
    """
    rows = y.shape[0]
    if pad > 0:
        z = jnp.zeros((rows, pad), dtype=y.dtype)
        yp = jnp.concatenate([z, y, z], axis=1)
    else:
        yp = y
    conv = w_ref[0] * yp[:, 0:C]
    for j in range(1, k):
        conv = conv + w_ref[j] * yp[:, j:j + C]
    return jax.nn.sigmoid(conv)


def _vmem_budget_bytes():
    """~75% of physical VMEM.  Falls back on the device kind (v7x: 64 MiB/TC,
    v5e/v6e: 128 MiB) instead of a blanket-conservative constant."""
    phys = None
    try:
        phys = getattr(pltpu.get_tpu_info(), "vmem_capacity_bytes", None)
    except Exception:
        phys = None
    if not phys:
        kind = ""
        try:
            kind = jax.devices()[0].device_kind.lower()
        except Exception:
            pass
        phys = (64 << 20) if ("v7" in kind or "7x" in kind) else (128 << 20)
    return int(phys) * 3 // 4


def _num_tensorcores():
    """Best-effort TensorCore-per-chip count (v7x: 2).  Defaults to 1 when unknown."""
    try:
        info = pltpu.get_tpu_info()
        for attr in ("num_cores", "core_count", "num_tensorcores"):
            v = getattr(info, attr, None)
            if v:
                return int(v)
    except Exception:
        pass
    try:
        kind = jax.devices()[0].device_kind.lower()
        if "v7" in kind or "7x" in kind:
            return 2
    except Exception:
        pass
    return 1


# --------------------------------------------------------------------------------------
# Kernels
# --------------------------------------------------------------------------------------

def _eca_fused_kernel(x_ref, w_ref, o_ref, *, k, pad, C, inv_hw, channels_last):
    """Single pass on one batch block: pool -> conv -> sigmoid -> rescale.

    NCHW block: (1, C, HW); NHWC block: (1, HW, C).  x_ref is read separately for the
    pool and the rescale (no full-tile value held live across both consumers).
    """
    sp_axis = 1 if channels_last else 2
    y = jnp.sum(x_ref[...].astype(jnp.float32), axis=sp_axis) * inv_hw     # (1, C)
    gate = _channel_conv_sigmoid(y, w_ref, k=k, pad=pad, C=C)
    g = gate.astype(o_ref.dtype)
    g = g[:, None, :] if channels_last else g[:, :, None]
    o_ref[...] = (x_ref[...] * g).astype(o_ref.dtype)


def _eca_pool_sums_kernel(x_ref, s_ref, *, HW, chunk, channels_last):
    """Chunked pass 1: accumulate spatial sums into the resident (1, 1, Ct) out block."""
    h = pl.program_id(2)

    @pl.when(h == 0)
    def _():
        s_ref[...] = jnp.zeros_like(s_ref)

    x = x_ref[...].astype(jnp.float32)
    sp_axis = 1 if channels_last else 2
    if HW % chunk != 0:                                      # mask the padded tail block
        col = jax.lax.broadcasted_iota(jnp.int32, x.shape, sp_axis) + h * chunk
        x = jnp.where(col < HW, x, 0.0)
    s_ref[...] += jnp.sum(x, axis=sp_axis)[:, None, :]


def _eca_gate_kernel(s_ref, w_ref, g_ref, *, k, pad, C, inv_hw):
    """Chunked pass 2 (tiny): gate = sigmoid(conv(mean)) on the (B, 1, C) sums."""
    y = s_ref[...][:, 0, :] * inv_hw                         # (B, C), channels on lanes
    gate = _channel_conv_sigmoid(y, w_ref, k=k, pad=pad, C=C)
    g_ref[...] = gate[:, None, :]                            # (B, 1, C)


def _eca_scale_mul_kernel(x_ref, g_ref, o_ref):
    """Chunked pass 3: out = x * gate (gate pre-shaped for broadcast)."""
    x = x_ref[...]
    o_ref[...] = (x * g_ref[...].astype(x.dtype)).astype(o_ref.dtype)


# --------------------------------------------------------------------------------------
# Wrapper
# --------------------------------------------------------------------------------------

def eca_attention(x, conv_weight, k_size=3, *, channels_last=False, hw_chunk=None,
                  force_chunked=None, donate_input=False, vmem_budget=None):
    """ECA forward.

    x: (B, C, H, W) if channels_last=False, else (B, H, W, C).
    conv_weight: (1, 1, k_size) as in nn.Conv1d(1, 1, k_size, bias=False).
    """
    assert k_size % 2 == 1, "ECA requires odd k_size (PyTorch padding=(k-1)//2)"
    if channels_last:
        B, H, W, C = x.shape
    else:
        B, C, H, W = x.shape
    HW = H * W
    pad = (k_size - 1) // 2
    itemsize = jnp.dtype(x.dtype).itemsize

    w_flat = conv_weight.reshape(-1).astype(jnp.float32)     # (k_size,)
    if channels_last:
        x2 = x.reshape(B, HW, C)
        blk_full = (1, HW, C)
    else:
        x2 = x.reshape(B, C, HW)
        blk_full = (1, C, HW)

    budget = int(vmem_budget) if vmem_budget is not None else _vmem_budget_bytes()
    slack = 2 << 20
    block_bytes = C * HW * itemsize
    fits_double = 4 * block_bytes + slack <= budget           # in+out, double-buffered
    fits_single = 2 * block_bytes + slack <= budget           # in+out, Buffered(1)
    multi_core = _num_tensorcores() > 1
    # With B==1 the fused grid=(B,) keeps one TensorCore idle on multi-TC chips; the
    # chunked path's ("parallel","parallel") grids use both.
    prefer_chunked = (B == 1 and multi_core and HW >= 256)

    if force_chunked is None:
        use_chunked = (not fits_single) or prefer_chunked
    else:
        use_chunked = bool(force_chunked)

    alias = {0: 0} if donate_input else {}

    # ---------------------------- Fused single-pass path ----------------------------
    if not use_chunked:
        if fits_double:
            x_spec = pl.BlockSpec(blk_full, lambda b: (b, 0, 0))
            o_spec = pl.BlockSpec(blk_full, lambda b: (b, 0, 0))
        else:
            # Single-buffer the huge blocks so the fused (2x HBM traffic) path stays
            # selected under tight VMEM (v7x 64 MiB); lost overlap is negligible here.
            x_spec = pl.BlockSpec(blk_full, lambda b: (b, 0, 0),
                                  pipeline_mode=pl.Buffered(1))
            o_spec = pl.BlockSpec(blk_full, lambda b: (b, 0, 0),
                                  pipeline_mode=pl.Buffered(1))
        kernel = functools.partial(_eca_fused_kernel, k=k_size, pad=pad, C=C,
                                   inv_hw=1.0 / HW, channels_last=channels_last)
        out = pl.pallas_call(
            kernel,
            out_shape=jax.ShapeDtypeStruct(x2.shape, x.dtype),
            grid_spec=pltpu.PrefetchScalarGridSpec(
                num_scalar_prefetch=0,
                grid=(B,),
                in_specs=[x_spec,
                          pl.BlockSpec(memory_space=pltpu.MemorySpace.SMEM)],
                out_specs=o_spec,
            ),
            compiler_params=pltpu.CompilerParams(
                dimension_semantics=("parallel",),
                vmem_limit_bytes=budget,
            ),
            cost_estimate=pl.CostEstimate(
                flops=2 * B * C * HW,
                transcendentals=B * C,
                bytes_accessed=2 * B * C * HW * itemsize,
            ),
            input_output_aliases=alias,
        )(x2, w_flat)
        return out.reshape(x.shape)

    # ------------------------- Chunked three-pass fallback --------------------------
    # Chunk size from the VMEM budget: pass 3 holds ~4 (C x chunk)-sized buffers
    # (in + out, double-buffered) plus the tiny gate; keep lane/sublane alignment.
    align = 8 if channels_last else 128
    chunk_cap = max(align, (budget - slack) // (5 * C * itemsize))
    if hw_chunk is not None:
        chunk_cap = min(chunk_cap, int(hw_chunk))
    if HW <= chunk_cap:
        chunk = HW
    else:
        chunk = max(align, (int(chunk_cap) // align) * align)
    n_hw = pl.cdiv(HW, chunk)

    # Channel split of the pooling pass: only useful to occupy both TensorCores when
    # B == 1; the split channel block must stay tile-aligned on both layouts.
    n_c = 2 if (B == 1 and C % 256 == 0) else 1
    Ct = C // n_c

    if channels_last:
        x_pool_spec = pl.BlockSpec((1, chunk, Ct), lambda b, c, h: (b, h, c))
    else:
        x_pool_spec = pl.BlockSpec((1, Ct, chunk), lambda b, c, h: (b, c, h))

    sums = pl.pallas_call(
        functools.partial(_eca_pool_sums_kernel, HW=HW, chunk=chunk,
                          channels_last=channels_last),
        out_shape=jax.ShapeDtypeStruct((B, 1, C), jnp.float32),
        grid_spec=pltpu.PrefetchScalarGridSpec(
            num_scalar_prefetch=0,
            grid=(B, n_c, n_hw),                              # reduction axis last
            in_specs=[x_pool_spec],
            out_specs=pl.BlockSpec((1, 1, Ct), lambda b, c, h: (b, 0, c)),
        ),
        compiler_params=pltpu.CompilerParams(
            dimension_semantics=("parallel", "parallel", "arbitrary"),
            vmem_limit_bytes=budget,
        ),
        cost_estimate=pl.CostEstimate(
            flops=B * C * HW, transcendentals=0,
            bytes_accessed=B * C * HW * itemsize),
    )(x2)

    gate = pl.pallas_call(
        functools.partial(_eca_gate_kernel, k=k_size, pad=pad, C=C, inv_hw=1.0 / HW),
        out_shape=jax.ShapeDtypeStruct((B, 1, C), jnp.float32),
        grid_spec=pltpu.PrefetchScalarGridSpec(
            num_scalar_prefetch=0,
            grid=(1,),
            in_specs=[pl.BlockSpec((B, 1, C), lambda i: (0, 0, 0)),
                      pl.BlockSpec(memory_space=pltpu.MemorySpace.SMEM)],
            out_specs=pl.BlockSpec((B, 1, C), lambda i: (0, 0, 0)),
        ),
        compiler_params=pltpu.CompilerParams(dimension_semantics=("arbitrary",)),
        cost_estimate=pl.CostEstimate(
            flops=2 * k_size * B * C, transcendentals=B * C,
            bytes_accessed=8 * B * C),
    )(sums, w_flat)

    if channels_last:
        gate_b = gate                                          # (B, 1, C): bcast over HW
        x_mul_spec = pl.BlockSpec((1, chunk, C), lambda b, h: (b, h, 0))
        g_mul_spec = pl.BlockSpec((1, 1, C), lambda b, h: (b, 0, 0))
        o_mul_spec = pl.BlockSpec((1, chunk, C), lambda b, h: (b, h, 0))
    else:
        gate_b = jnp.transpose(gate, (0, 2, 1))                # (B, C, 1): bcast over HW
        x_mul_spec = pl.BlockSpec((1, C, chunk), lambda b, h: (b, 0, h))
        g_mul_spec = pl.BlockSpec((1, C, 1), lambda b, h: (b, 0, 0))
        o_mul_spec = pl.BlockSpec((1, C, chunk), lambda b, h: (b, 0, h))

    out = pl.pallas_call(
        _eca_scale_mul_kernel,
        out_shape=jax.ShapeDtypeStruct(x2.shape, x.dtype),
        grid_spec=pltpu.PrefetchScalarGridSpec(
            num_scalar_prefetch=0,
            grid=(B, n_hw),
            in_specs=[x_mul_spec, g_mul_spec],
            out_specs=o_mul_spec,
        ),
        compiler_params=pltpu.CompilerParams(
            dimension_semantics=("parallel", "parallel"),      # both v7x TCs busy
            vmem_limit_bytes=budget,
        ),
        cost_estimate=pl.CostEstimate(
            flops=B * C * HW, transcendentals=0,
            bytes_accessed=2 * B * C * HW * itemsize),
        input_output_aliases=alias,
    )(x2, gate_b)
    return out.reshape(x.shape)


# --------------------------------------------------------------------------------------
# Pure-JAX reference (matches the PyTorch forward exactly, NCHW)
# --------------------------------------------------------------------------------------

def eca_reference(x, conv_weight, k_size=3):
    B, C, H, W = x.shape
    pad = (k_size - 1) // 2
    w = conv_weight.reshape(-1)
    y = jnp.mean(x, axis=(2, 3))                              # (B, C) avg pool
    yp = jnp.pad(y, ((0, 0), (pad, pad)))                     # zero-padded channel axis
    conv = sum(w[j] * yp[:, j:j + C] for j in range(k_size))
    s = jax.nn.sigmoid(conv)
    return x * s[:, :, None, None]


if __name__ == "__main__":
    key = jax.random.PRNGKey(0)
    kx, kw = jax.random.split(key)
    k_size = 3
    # Conv1d(1, 1, k_size, bias=False) weight shape: (out_ch=1, in_ch=1, k_size)
    conv_weight = jax.random.normal(kw, (1, 1, k_size), dtype=jnp.float32) * 0.5

    # 1) NCHW fused single-pass path (HW multiple of 128).
    x = jax.random.normal(kx, (2, 4, 16, 16), dtype=jnp.float32)
    ref = eca_reference(x, conv_weight, k_size)
    out = jax.block_until_ready(eca_attention(x, conv_weight, k_size))
    assert out.shape == x.shape
    assert jnp.allclose(out, ref, atol=1e-5, rtol=1e-5), "fused NCHW mismatch"

    # 2) NCHW chunked fallback (forced; chunk divides HW exactly).
    out_c = jax.block_until_ready(
        eca_attention(x, conv_weight, k_size, hw_chunk=128, force_chunked=True))
    assert jnp.allclose(out_c, ref, atol=1e-5, rtol=1e-5), "chunked NCHW mismatch"

    # 3) NCHW chunked with ragged spatial tail and B==1 channel-split pooling.
    x1 = jax.random.normal(kx, (1, 256, 12, 12), dtype=jnp.float32)
    ref1 = eca_reference(x1, conv_weight, k_size)
    out1 = jax.block_until_ready(
        eca_attention(x1, conv_weight, k_size, hw_chunk=128, force_chunked=True))
    assert jnp.allclose(out1, ref1, atol=1e-5, rtol=1e-5), "ragged/B1 chunked mismatch"

    # 4) Channels-last (NHWC) fused path: late-stage shape, lane-dense C, HW=49.
    xl = jax.random.normal(kx, (2, 7, 7, 128), dtype=jnp.float32)
    refl = eca_reference(jnp.transpose(xl, (0, 3, 1, 2)), conv_weight, k_size)
    outl = jax.block_until_ready(
        eca_attention(xl, conv_weight, k_size, channels_last=True))
    assert jnp.allclose(jnp.transpose(outl, (0, 3, 1, 2)), refl,
                        atol=1e-5, rtol=1e-5), "fused NHWC mismatch"

    # 5) Channels-last chunked fallback with a ragged spatial tail.
    outlc = jax.block_until_ready(
        eca_attention(xl, conv_weight, k_size, hw_chunk=16, force_chunked=True,
                      channels_last=True))
    assert jnp.allclose(jnp.transpose(outlc, (0, 3, 1, 2)), refl,
                        atol=1e-5, rtol=1e-5), "chunked NHWC mismatch"

    # 6) bf16 fused path (gate multiply done in reduced precision, tolerance-tested).
    xb = x.astype(jnp.bfloat16)
    refb = eca_reference(xb.astype(jnp.float32), conv_weight, k_size)
    outb = jax.block_until_ready(eca_attention(xb, conv_weight, k_size))
    assert outb.dtype == jnp.bfloat16
    assert jnp.allclose(outb.astype(jnp.float32), refb, atol=3e-2, rtol=3e-2), \
        "bf16 fused mismatch"

    print("KERNEL_OK")
</pallas_src>

<mosaic_0001>
module attributes {stable_mosaic.version = 11 : i64} {
  func.func @_eca_fused_kernel(%arg0: i32, %arg1: memref<1x4x256xf32, #tpu.memory_space<vmem>>, %arg2: memref<3xf32, #tpu.memory_space<smem>>, %arg3: memref<1x4x256xf32, #tpu.memory_space<vmem>>) attributes {dimension_semantics = [#tpu.dimension_semantics<parallel>], iteration_bounds = array<i64: 2>, scalar_prefetch = 0 : i64, scratch_operands = 0 : i64, tpu.core_type = #tpu.core_type<tc>, window_params = [{transform_indices = @transform_0, window_bounds = array<i64: 1, 4, 256>}, {transform_indices = @transform_1, window_bounds = array<i64: 3>}, {transform_indices = @transform_2, window_bounds = array<i64: 1, 4, 256>}]} {
    %c0 = arith.constant 0 : index
    %c0_0 = arith.constant 0 : index
    %c0_1 = arith.constant 0 : index
    %0 = vector.load %arg1[%c0, %c0_0, %c0_1] : memref<1x4x256xf32, #tpu.memory_space<vmem>>, vector<1x4x256xf32>
    %cst = arith.constant dense<0.000000e+00> : vector<1x4xf32>
    %1 = vector.multi_reduction <add>, %0, %cst [2] : vector<1x4x256xf32> to vector<1x4xf32>
    %cst_2 = arith.constant 3.906250e-03 : f32
    %2 = vector.broadcast %cst_2 : f32 to vector<1x4xf32>
    %3 = arith.mulf %1, %2 : vector<1x4xf32>
    %cst_3 = arith.constant 0.000000e+00 : f32
    %4 = vector.broadcast %cst_3 : f32 to vector<1x1xf32>
    %5 = tpu.concatenate %4, %3, %4 in 1 : vector<1x1xf32>, vector<1x4xf32>, vector<1x1xf32> -> vector<1x6xf32>
    %c0_4 = arith.constant 0 : index
    %6 = memref.load %arg2[%c0_4] : memref<3xf32, #tpu.memory_space<smem>>
    %7 = vector.extract_strided_slice %5 {offsets = [0, 0], sizes = [1, 4], strides = [1, 1]} : vector<1x6xf32> to vector<1x4xf32>
    %8 = vector.broadcast %6 : f32 to vector<1x4xf32>
    %9 = arith.mulf %8, %7 : vector<1x4xf32>
    %c1 = arith.constant 1 : index
    %10 = memref.load %arg2[%c1] : memref<3xf32, #tpu.memory_space<smem>>
    %11 = vector.extract_strided_slice %5 {offsets = [0, 1], sizes = [1, 4], strides = [1, 1]} : vector<1x6xf32> to vector<1x4xf32>
    %12 = vector.broadcast %10 : f32 to vector<1x4xf32>
    %13 = arith.mulf %12, %11 : vector<1x4xf32>
    %14 = arith.addf %9, %13 : vector<1x4xf32>
    %c2 = arith.constant 2 : index
    %15 = memref.load %arg2[%c2] : memref<3xf32, #tpu.memory_space<smem>>
    %16 = vector.extract_strided_slice %5 {offsets = [0, 2], sizes = [1, 4], strides = [1, 1]} : vector<1x6xf32> to vector<1x4xf32>
    %17 = vector.broadcast %15 : f32 to vector<1x4xf32>
    %18 = arith.mulf %17, %16 : vector<1x4xf32>
    %19 = arith.addf %14, %18 : vector<1x4xf32>
    %20 = arith.negf %19 : vector<1x4xf32>
    %21 = math.exp %20 : vector<1x4xf32>
    %cst_5 = arith.constant 1.000000e+00 : f32
    %22 = vector.broadcast %cst_5 : f32 to vector<1x4xf32>
    %23 = arith.addf %22, %21 : vector<1x4xf32>
    %24 = arith.divf %22, %23 : vector<1x4xf32>
    %25 = vector.shape_cast %24 : vector<1x4xf32> to vector<1x4x1xf32>
    %c0_6 = arith.constant 0 : index
    %c0_7 = arith.constant 0 : index
    %c0_8 = arith.constant 0 : index
    %26 = vector.load %arg1[%c0_6, %c0_7, %c0_8] : memref<1x4x256xf32, #tpu.memory_space<vmem>>, vector<1x4x256xf32>
    %27 = vector.broadcast %25 : vector<1x4x1xf32> to vector<1x4x256xf32>
    %28 = arith.mulf %26, %27 : vector<1x4x256xf32>
    %c0_9 = arith.constant 0 : index
    %c0_10 = arith.constant 0 : index
    %c0_11 = arith.constant 0 : index
    %29 = vector.load %arg3[%c0_9, %c0_10, %c0_11] : memref<1x4x256xf32, #tpu.memory_space<vmem>>, vector<1x4x256xf32>
    tpu.vector_store %arg3[%c0_9, %c0_10, %c0_11], %28 {strides = array<i32>} : memref<1x4x256xf32, #tpu.memory_space<vmem>>, vector<1x4x256xf32>,
    return
  }
  func.func @transform_0(%arg0: i32) -> (i32, i32, i32) {
    %c0_i32 = arith.constant 0 : i32
    %c0_i32_0 = arith.constant 0 : i32
    %c0_i32_1 = arith.constant 0 : i32
    return %arg0, %c0_i32, %c0_i32_0 : i32, i32, i32
  }
  func.func @transform_1(%arg0: i32) -> i32 {
    %c0_i32 = arith.constant 0 : i32
    %c0_i32_0 = arith.constant 0 : i32
    return %c0_i32 : i32
  }
  func.func @transform_2(%arg0: i32) -> (i32, i32, i32) {
    %c0_i32 = arith.constant 0 : i32
    %c0_i32_0 = arith.constant 0 : i32
    %c0_i32_1 = arith.constant 0 : i32
    return %arg0, %c0_i32, %c0_i32_0 : i32, i32, i32
  }
}

</mosaic_0001>

<bundles_post_ra>
// kernel: tpu_custom_call.1
= control target key start
LH: loop header
LB: loop body
LE: loop exit
PB: predicated region body
PF: predicated region fallthrough
CT: control target
= control target key end

     0   :  { %7 = vsyncpa [#allocation3], 0  ;;  %s767_s0 = inlined_call_operand.hbm [shape: f32[2,4,256], index: 0, kind: input, shape index: {}]   ;;  %s768_s1 = inlined_call_operand.hbm [shape: f32[3], index: 1, kind: input, shape index: {}]   ;;  %s769_s2 = inlined_call_operand.hbm [shape: f32[2,4,256], index: 2, kind: output, shape index: {}]  }
   0x1   :  { %9 = vsyncpa [#allocation3 + $0x1], 0 }
   0x2   :  { %10 = vsyncpa [#allocation5], 0 }
   0x3   :  { %11 = vsyncpa [#allocation4], 0 }
   0x4   :  { %13 = vsyncpa [#allocation4 + $0x1], 0  ;;  %s558_s9 = smov 0   ;;  %s560_s10 = smov 0  }
   0x5   :  { %s562_s11 = smov 0   ;;  %s564_s12 = smov 0  }
   0x6 LB: > { %s579_s13 = sadd.s32 4294967295, %s535_s12   ;;  %s336_s14 = sadd.s32 4294967294, %s535_s12   ;;  %s535_s12 = sphi %s564_s12, %s790_s12   ;;  %s531_s11 = sphi %s562_s11, %s789_s11   ;;  %s527_s10 = sphi %s560_s10, %s788_s10   ;;  %s523_s9 = sphi %s558_s9, %s787_s9  }
   0x7   : > { %p39_p0 = scmp.ne.s32.totalorder %s527_s10, %s523_s9  ;;  %p770_p1 = scmp.eq.s32.totalorder %s579_s13, 0 }
   0x8   : > { %p90_p3 = scmp.eq.s32.totalorder %s336_s14, 1  ;;  %p337_p5 = scmp.ge.s32.totalorder %s535_s12, 1 }
   0x9   : > { %p588_p4 = por %p770_p1, %p39_p0  ;;  %p97_p7 = scmp.lt.s32.totalorder %s535_s12, 3 }
   0xa   : > { %p593_p6 = por %p90_p3, %p39_p0  ;;  %s604_s18 = sadd.s32 1, %s535_s12  }
   0xb   : > { %s773_s15 = scalar_select %p588_p4, 1, 0 }
   0xc   : > { %s774_s16 = scalar_select %p593_p6, 1, 0 }
   0xd   : > { %p598_p8 = pnand %p337_p5, %p97_p7  ;;  %s23_s19 = ssub.s32 %s535_s12, %s604_s18 }
   0xe   : > { %s26_s20 = sadd.s32 1, %s531_s11  ;;  %p617_p12 = scmp.eq.s32.totalorder %s23_s19, 0 }
   0xf   : > { %p365_p10 = pneg %p598_p8  ;;  %p33_p13 = scmp.ne.s32.totalorder %s531_s11, %s527_s10 }
  0x10   : > { %p34_p0 = scmp.eq.s32.totalorder %s535_s12, 0  ;;  %p378_p3 = scmp.lt.s32.totalorder %s535_s12, 2 }
  0x11   : > { %p613_p11 = pnand %p365_p10, %p770_p1  ;;  %s422_s25 = scalar_lea.hbm %s768_s1, 16 }
  0x12   : > { %p423_p5 = scmp.ne.s32.totalorder %s768_s1, %s422_s25  ;;  %p429_p1 = scmp.lt.u32.totalorder %s422_s25, %s768_s1 }
  0x13   : > { %p424_p7 = pneg %p613_p11 }
  0x15   : > { %p425_p10 = pnand %p424_p7, %p423_p5 }
  0x17   : > { %p426_p9 = pneg %p425_p10 }
  0x19   : > { %p431_p2 = pnand %p429_p1, %p426_p9 }
  0x1b   : > { %434 = shalt.err (!%p431_p2)
}
  0x1c   : > { %s537_s30 = smov [#allocation6]   ;;  %p35_p1 = por %p34_p0, %p33_p13 }
  0x1d   : > { %368 = dma.hbm_to_smem (!%p613_p11), %s768_s1, 16, %s537_s30, [#allocation5]  }
  0x1e   : > { %s644_s5 = scalar_select %p617_p12, %s531_s11, %s26_s20  }
  0x1f   : > { %p778_p2 = scmp.eq.s32.totalorder %s579_s13, 1  ;;  %s119_s7 = sand.u32 1, %s531_s11  }
  0x20   : > { %s355_s8 = sshll.u32 %s535_s12, 7  ;;  %s340_s14 = sshll.u32 %s119_s7, 3 }
  0x21   : > { %p656_p9 = por %p778_p2, %p33_p13  ;;  %s665_s23 = scalar_lea.hbm %s767_s0, %s355_s8 }
  0x22   : > { %s123_s20 = scalar_lea.vmem [#allocation2], %s340_s14  ;;  %p669_p11 = pnand %p378_p3, %p35_p1 }
  0x23   : > { %s779_s6 = scalar_select %p656_p9, 1, 0 }
  0x24   : > { %s131_s22 = sshll.u32 %s123_s20, 4  ;;  %s120_s25 = scalar_lea.sflag [#allocation3], %s119_s7  ;;  %s673_s22 = int_to_ptr.vmem [resolvable:$true] %s131_s22 }
  0x25   : > { %s435_s26 = scalar_lea.hbm %s665_s23, 128  ;;  %p437_p13 = pneg %p669_p11 }
  0x26   : > { %p436_p12 = scmp.ne.s32.totalorder %s665_s23, %s435_s26  ;;  %s440_s29 = scalar_lea.hbm %s767_s0, 256 }
  0x27   : > { %p441_p3 = scmp.lt.u32.totalorder %s665_s23, %s767_s0  ;;  %p442_p7 = scmp.lt.u32.totalorder %s440_s29, %s435_s26 }
  0x28   : > { %p438_p0 = pnand %p437_p13, %p436_p12  ;;  %p444_p1 = scmp.lt.u32.totalorder %s435_s26, %s665_s23 }
  0x29   : > { %p443_p10 = por %p442_p7, %p441_p3 }
  0x2a   : > { %p439_p5 = pneg %p438_p0 }
  0x2b   : > { %p445_p2 = por %p444_p1, %p443_p10 }
  0x2d   : > { %p446_p6 = pnand %p445_p2, %p439_p5 }
  0x2f   : > { %449 = shalt.err (!%p446_p6)
}
  0x30   : > { %s450_s4 = scalar_lea.vmem %s673_s22, 128  ;;  %s538_s7 = smov [#allocation2]  }
  0x31   : > { %p451_p12 = scmp.ne.s32.totalorder %s673_s22, %s450_s4  ;;  %s455_s8 = sshll.u32 %s538_s7, 4  ;;  %s456_s8 = int_to_ptr.vmem [resolvable:$false] %s455_s8 }
  0x32   : > { %s457_s14 = scalar_lea.vmem %s456_s8, 256  ;;  %p458_p4 = scmp.lt.s32.totalorder %s673_s22, %s456_s8 }
  0x33   : > { %p453_p0 = pnand %p451_p12, %p437_p13  ;;  %p459_p3 = scmp.lt.s32.totalorder %s457_s14, %s450_s4 }
  0x35   : > { %p454_p9 = pneg %p453_p0  ;;  %p460_p7 = por %p459_p3, %p458_p4 }
  0x37   : > { %p461_p10 = pnand %p460_p7, %p454_p9 }
  0x39   : > { %464 = shalt.err (!%p461_p10)
}
  0x3a   : > { %372 = dma.hbm_to_vmem [thread:$0]  (!%p669_p11), %s665_s23, 128, %s673_s22, %s120_s25  }
  0x3b   : > { %140 = sbr.rel (%p598_p8) target bundleno = 509 (0x1fd), region = 28  ;;  %s703_s19 = sand.u32 (!%p598_p8), 1, %s527_s10  }
  0x3c   : > { %s344_s21 = sshll.u32 (!%p598_p8), %s703_s19, 3  ;;  %s143_s20 = scalar_lea.sflag (!%p598_p8), [#allocation3], %s703_s19 }
  0x3d   : > { %s146_s26 = scalar_lea.vmem (!%p598_p8), [#allocation2], %s344_s21  ;;  %p781_p4 = scmp.ne.s32.totalorder (!%p598_p8), %s773_s15, 0 }
  0x42   : > { %510 = dma.done.wait (%p781_p4), %s143_s20, 128  }
  0x43   : > { %512 = vsyncadd (%p781_p4), %s143_s20, 4294967168  ;;  %p782_p6 = scmp.eq.s32.totalorder %s579_s13, 0 }
  0x45   : > { %514 = dma.done.wait (%p782_p6), [#allocation5], 16   ;;  %p783_p8 = pmov %p782_p6 }
  0x47   : > { %516 = vsyncadd (%p783_p8), [#allocation5], 4294967280 }
  0x48   : > { %155 = sfence }
  0x49   : > { %v172_v0 = vld [vmem:[%s146_s26] sm:$0xff]  ;;  %vm176_vm0 = vcmask 1043456   ;;  %v184_v5 = vlaneseq  ;;  %s348_s15 = sld [smem:[#allocation6 + $0x2]]  ;;  %s347_s17 = sld [smem:[#allocation6 + $0x1]]  ;;  %vm192_vm1 = vcmask 7168   ;;  %vm194_vm2 = vcmask 39936  }
  0x4a   : > { %v174_v1 = vcombine.high %v172_v0, %v172_v0  ;;  %v177_v2 = vsel %vm176_vm0, %v172_v0, 0.0  ;;  %s539_s23 = smov 126   ;;  %s540_s22 = smov 127   ;;  %v541_v31 = vmov 839922192  }
  0x4b   : > { %v185_v6 = vand.u32 127, %v184_v5  ;;  %v188_v8 = vshrl.u32 %v184_v5, 7  ;;  %s196_s24 = sld [smem:[#allocation6]]  ;;  %v230_v32 = vunpack.c.l.s4 %v541_v31  ;;  %s356_s25 = sshll.u32 %s579_s13, 7 }
  0x4c   : > { %v178_v3 = vsel %vm176_vm0, %v174_v1, 0.0  ;;  %s171_s27 = scalar_lea.vmem [#allocation7], %s344_s21  ;;  %s723_s3 = scalar_lea.hbm %s769_s2, %s356_s25 }
  0x4d   : > { %v179_v4 = vadd.f32 %v178_v3, %v177_v2  ;;  %v186_v7 = vadd.s32 4294967295, %v185_v6  ;;  %v223_v28 = vsub.s32 0, %v188_v8  ;;  %v231_v33 = vunpack.c.0.s8 %v230_v32  ;;  %s254_s28 = sshll.u32 %s171_s27, 4  ;;  %s240_s4 = scalar_lea.sflag [#allocation4], %s703_s19  ;;  %s725_s28 = int_to_ptr.vmem [resolvable:$true] %s254_s28 }
  0x4e   : > { %s465_s7 = scalar_lea.vmem %s725_s28, 128  ;;  %p784_p11 = scmp.ne.s32.totalorder %s779_s6, 0 }
  0x4f   : > { %180 = vadd.xlane.f32.xlu0 %v179_v4  ;;  %v189_v9 = vsub.s32 %v186_v7, %v188_v8  ;;  %v208_v13 = vstv %s348_s15  ;;  %v200_v14 = vstv %s347_s17  ;;  %v234_v34 = vsub.s32 %v231_v33, %v188_v8  ;;  %p466_p9 = scmp.ne.s32.totalorder %s725_s28, %s465_s7  ;;  %s542_s13 = smov [#allocation7]  }
  0x50   : > { %s469_s8 = sshll.u32 %s542_s13, 4  ;;  %s470_s8 = int_to_ptr.vmem [resolvable:$false] %s469_s8 }
  0x51   : > { %v197_v19 = vstv %s196_s24  ;;  %p467_p13 = pnand %p466_p9, %p784_p11  ;;  %s471_s14 = scalar_lea.vmem %s470_s8, 256 }
  0x52   : > { %p472_p1 = scmp.lt.s32.totalorder %s725_s28, %s470_s8  ;;  %p473_p2 = scmp.lt.s32.totalorder %s471_s14, %s465_s7 }
  0x53   : > { %p468_p5 = pneg %p467_p13 }
  0x54   : > { %p474_p12 = por %p473_p2, %p472_p1 }
  0x56   : > { %p475_p0 = pnand %p474_p12, %p468_p5 }
  0xdc   : > { %v181_v10 = vpop.xlane.xlu0 %180 }
  0xdd   : > { %v182_v11 = vmul.f32 0.00390625, %v181_v10 }
  0xdf   : > { %v190_v12 = vrot.slane %v182_v11, %v189_v9 }
  0xe1   : > { %v193_v15 = vsel %vm192_vm1, 0.0, %v190_v12 }
  0xe2   : > { %v195_v16 = vsel %vm194_vm2, %v193_v15, 0.0 }
  0xe3   : > { %v209_v17 = vmul.f32 %v208_v13, %v195_v16  ;;  %v201_v18 = vmul.f32 %v200_v14, %v195_v16  ;;  %v198_v20 = vmul.f32 %v197_v19, %v195_v16 }
  0xe5   : > { %211 = vrot.lane.b32.xlu1 %v209_v17, %s539_s23  ;;  %203 = vrot.lane.b32.xlu0 %v201_v18, %s540_s22 }
 0x157   : > { %v204_v21 = vpop.permute.xlu0 %203  ;;  %v212_v23 = vpop.permute.xlu1 %211 }
 0x158   : > { %v206_v22 = vadd.f32 %v204_v21, %v198_v20 }
 0x15a   : > { %v214_v24 = vadd.f32 %v212_v23, %v206_v22 }
 0x15c   : > { %v349_v25 = vmul.f32 -1.442695, %v214_v24 }
 0x15e   : > { %418 = vpow2.f32 %v349_v25 }
 0x168   : > { %v419_v26 = vpop.eup %418 }
 0x169   : > { %v218_v27 = vadd.f32 1.0, %v419_v26 }
 0x16b   : > { %420 = vrcp.f32 %v218_v27 }
 0x175   : > { %v421_v29 = vpop.eup %420 }
 0x176   : > { %v224_v30 = vrot.slane %v421_v29, %v223_v28 }
 0x178   : > { %226 = vbcast.lane.b32.xlu1 %v224_v30, 256 }
 0x1ea   : > { %v227_v35 = vpop.permute.xlu1 %226 }
 0x1eb   : > { %v235_v36 = vrot.slane %v227_v35, %v234_v34 }
 0x1ed   : > { %v237_v37 = vmul.f32 %v235_v36, %v172_v0 }
 0x1ef   : > { %238 = vst [vmem:[%s171_s27] sm:$0xff] %v237_v37 }
 0x1f0   : > { %478 = shalt.err (!%p475_p0)
}
 0x1f1   : > { %s479_s19 = scalar_lea.hbm %s723_s3, 128  ;;  %s483_s26 = scalar_lea.hbm %s769_s2, 256 }
 0x1f2   : > { %p480_p3 = scmp.ne.s32.totalorder %s723_s3, %s479_s19  ;;  %p484_p4 = scmp.lt.u32.totalorder %s723_s3, %s769_s2 }
 0x1f3   : > { %p485_p6 = scmp.lt.u32.totalorder %s483_s26, %s479_s19  ;;  %p487_p9 = scmp.lt.u32.totalorder %s479_s19, %s723_s3 }
 0x1f4   : > { %p481_p7 = pnand %p480_p3, %p784_p11 }
 0x1f5   : > { %p486_p8 = por %p485_p6, %p484_p4 }
 0x1f6   : > { %p482_p10 = pneg %p481_p7 }
 0x1f7   : > { %p488_p13 = por %p487_p9, %p486_p8 }
 0x1f9   : > { %p489_p5 = pnand %p488_p13, %p482_p10 }
 0x1fb   : > { %492 = shalt.err (!%p489_p5)
}
 0x1fc   : > { %363 = dma.vmem_to_hbm [thread:$0]  (%p784_p11), %s725_s28, 128, %s723_s3, %s240_s4  }
 0x1fd PF: > { %s266_s23 = sand.u32 1, %s523_s9   ;;  %p785_p1 = scmp.ne.s32.totalorder %s774_s16, 0 }
 0x1fe   : > { %p786_p2 = scmp.ge.s32.totalorder %s535_s12, 2  ;;  %s267_s22 = scalar_lea.sflag [#allocation4], %s266_s23 }
 0x200   : > { %p374_p12 = pnand %p786_p2, %p785_p1 }
 0x202   : > { %518 = dma.done.wait (!%p374_p12), %s267_s22, 128  }
 0x203   : > { %520 = vsyncadd (!%p374_p12), %s267_s22, 4294967168  ;;  %p16_p0 = scmp.ge.s32.totalorder %s604_s18, 4   ;;  %s787_s9 = smov %s527_s10 }
 0x204   : > { %s788_s10 = smov %s531_s11  ;;  %s789_s11 = smov %s644_s5 }
 0x205   : > { %s790_s12 = smov %s604_s18  ;;  %18 = sbr.rel (!%p16_p0) target bundleno = 6 (0x6), region = 78 }
 0x20c   :  { %272 = vsyncpa [#allocation3], 1 }
 0x20d   :  { %274 = vsyncpa [#allocation3 + $0x1], 1 }
 0x20e   :  { %275 = vsyncpa [#allocation4], 1 }
 0x20f   :  { %277 = vsyncpa [#allocation4 + $0x1], 1 }
 0x210   :  { %278 = vsyncpa [#allocation5], 1 }
 0x211   :  { %280 = vsyncpa [#allocation5 + $0x1], 1 }

</bundles_post_ra>
